<compile_context>
chip_gen: v7x
topology: tpu7x:2x2x1
jax: 0.10.0
libtpu: 0.0.40
codegen_flags: <defaults>
</compile_context>

<pallas_src>
import jax
import jax.numpy as jnp
from jax.experimental import pallas as pl
from jax.experimental.pallas import tpu as pltpu


# -----------------------------------------------------------------------------
# Kernels
# -----------------------------------------------------------------------------
def _w2v_gather_vmem_kernel(ids_ref, table_ref, out_ref):
    """Gather rows from a VMEM-resident table; zero rows for padded positions.

    ids_ref   : SMEM int32 [seq]         (scalar prefetch; -1 marks a padded slot)
    table_ref : VMEM f32   [vocab, emb]  (entire table resident on-chip)
    out_ref   : VMEM f32   [seq, emb]
    """
    seq = out_ref.shape[0]
    zero_row = jnp.zeros((1, out_ref.shape[1]), out_ref.dtype)  # hoisted once
    for j in range(seq):  # static unroll; seq is small
        idx = ids_ref[j]
        row = table_ref[pl.ds(jnp.maximum(idx, 0), 1), :]
        out_ref[pl.ds(j, 1), :] = jnp.where(idx >= 0, row, zero_row)


def _w2v_gather_hbm_kernel(ids_ref, emb_hbm, out_ref, sem):
    """Gather rows straight from the HBM table into the output block (no staging).

    ids_ref : SMEM int32 [seq]         (scalar prefetch; -1 marks a padded slot)
    emb_hbm : HBM  f32   [vocab, emb]  (memory_space=pl.ANY, manual row DMAs)
    out_ref : VMEM f32   [seq, emb]    (DMA destination; written back by the pipeline)
    sem     : shared DMA semaphore for all row copies
    """
    seq = out_ref.shape[0]
    zero_row = jnp.zeros((1, out_ref.shape[1]), out_ref.dtype)

    # Phase 1: read every id (SMEM) and issue all row DMAs back-to-back so HBM
    # latency overlaps across rows.  Padded positions get a cheap vector store of
    # zeros instead of a DMA round-trip.  All SMEM reads happen before any wait.
    copies = []
    for j in range(seq):
        idx = ids_ref[j]
        is_real = idx >= 0
        cp = pltpu.make_async_copy(
            emb_hbm.at[pl.ds(jnp.maximum(idx, 0), 1), :],
            out_ref.at[pl.ds(j, 1), :],
            sem,
        )

        @pl.when(is_real)
        def _():
            cp.start()

        @pl.when(jnp.logical_not(is_real))
        def _():
            out_ref[pl.ds(j, 1), :] = zero_row

        copies.append((cp, is_real))

    # Phase 2: wait for every issued copy (same descriptors, same shared semaphore).
    for cp, is_real in copies:
        @pl.when(is_real)
        def _():
            cp.wait()


# -----------------------------------------------------------------------------
# Host-side wrapper (reproduces Word2Vec_Embedding.forward semantics)
# -----------------------------------------------------------------------------
def _vmem_table_budget_bytes() -> int:
    """Conservative budget for keeping the table resident in VMEM (per generation)."""
    try:
        phys = int(pltpu.get_tpu_info().vmem_capacity_bytes)
    except Exception:
        phys = 64 * 1024 * 1024  # v7x has the smallest VMEM of current generations
    return (3 * phys) // 4       # headroom for double-buffering / scoped allocations


def _prepare_ids(token_ids: jnp.ndarray, seq_size: int, vocab: int) -> jnp.ndarray:
    """Crop / pad token ids to exactly `seq_size`; padded slots get the -1 sentinel."""
    ids = token_ids.astype(jnp.int32)
    n = ids.shape[0]
    if n >= seq_size:
        ids = ids[:seq_size]
    else:
        ids = jnp.concatenate(
            [ids, jnp.full((seq_size - n,), -1, dtype=jnp.int32)])
    # Defensive clamp (module assumes OOV ids were already dropped host-side).
    return jnp.where(ids >= 0, jnp.clip(ids, 0, vocab - 1), jnp.int32(-1))


def word2vec_embedding(token_ids: jnp.ndarray,
                       emb_table: jnp.ndarray,
                       seq_size: int,
                       *,
                       table_in_vmem: bool | None = None) -> jnp.ndarray:
    """Forward pass: gather `token_ids` rows of `emb_table`, crop/zero-pad to seq_size.

    token_ids : int32 [num_tokens]   (tokenization + vocab lookup done host-side)
    emb_table : f32   [vocab, emb_dim]
    returns   : f32   [seq_size, emb_dim]
    """
    # TODO(synk): BertTokenizer.tokenize + gensim key_to_index are host string ops
    # with no Pallas equivalent; simulated by the precomputed `token_ids`.
    vocab, emb_dim = emb_table.shape
    ids = _prepare_ids(token_ids, seq_size, vocab)

    itemsize = jnp.dtype(emb_table.dtype).itemsize
    table_bytes = vocab * emb_dim * itemsize
    out_bytes = seq_size * emb_dim * itemsize
    vmem_needed = 2 * table_bytes + 2 * out_bytes + (2 << 20)
    if table_in_vmem is None:
        table_in_vmem = vmem_needed <= _vmem_table_budget_bytes()

    out_shape = jax.ShapeDtypeStruct((seq_size, emb_dim), emb_table.dtype)

    if table_in_vmem:
        # Fast path: whole table resident in VMEM, in-kernel dynamic-slice gather.
        kernel = pl.pallas_call(
            _w2v_gather_vmem_kernel,
            out_shape=out_shape,
            grid_spec=pltpu.PrefetchScalarGridSpec(
                num_scalar_prefetch=1,
                grid=(1,),
                in_specs=[pl.BlockSpec((vocab, emb_dim), lambda i, _ids: (0, 0))],
                out_specs=pl.BlockSpec((seq_size, emb_dim), lambda i, _ids: (0, 0)),
            ),
            compiler_params=pltpu.CompilerParams(
                dimension_semantics=("arbitrary",),
                vmem_limit_bytes=int(max(vmem_needed, 32 * 1024 * 1024)),
            ),
        )
    else:
        # Large-vocab path: table stays in HBM; one grid step issues all row DMAs
        # straight into the output block.
        kernel = pl.pallas_call(
            _w2v_gather_hbm_kernel,
            out_shape=out_shape,
            grid_spec=pltpu.PrefetchScalarGridSpec(
                num_scalar_prefetch=1,
                grid=(1,),
                in_specs=[pl.BlockSpec(memory_space=pl.ANY)],
                out_specs=pl.BlockSpec((seq_size, emb_dim), lambda i, _ids: (0, 0)),
                scratch_shapes=[pltpu.SemaphoreType.DMA(())],
            ),
            compiler_params=pltpu.CompilerParams(
                dimension_semantics=("arbitrary",),
            ),
        )

    return kernel(ids, emb_table)


# -----------------------------------------------------------------------------
# Demo / self-test
# -----------------------------------------------------------------------------
if __name__ == "__main__":
    # EMB_DIM=300 mirrors real GoogleNews word2vec (non-128-aligned lane width);
    # SEQ_SIZE=12 with 5 real tokens exercises zero padding, 20 tokens exercises crop.
    VOCAB, EMB_DIM, SEQ_SIZE = 1000, 300, 12
    NUM_TOKENS_SHORT = 5
    NUM_TOKENS_LONG = 20

    key = jax.random.PRNGKey(0)
    k_emb, k_short, k_long = jax.random.split(key, 3)

    emb_table = jax.random.normal(k_emb, (VOCAB, EMB_DIM), dtype=jnp.float32)
    ids_short = jax.random.randint(k_short, (NUM_TOKENS_SHORT,), 0, VOCAB, dtype=jnp.int32)
    ids_long = jax.random.randint(k_long, (NUM_TOKENS_LONG,), 0, VOCAB, dtype=jnp.int32)

    def reference(token_ids):
        n = min(token_ids.shape[0], SEQ_SIZE)
        rows = jnp.take(emb_table, token_ids[:n], axis=0)
        return jnp.zeros((SEQ_SIZE, EMB_DIM), jnp.float32).at[:n].set(rows)

    # Auto-selected path (VMEM-resident table for this small vocab), padding case.
    out = jax.block_until_ready(word2vec_embedding(ids_short, emb_table, SEQ_SIZE))
    assert out.shape == (SEQ_SIZE, EMB_DIM)
    assert jnp.allclose(out, reference(ids_short), atol=1e-6), "VMEM path (pad) mismatch"

    # Cropping case (num_tokens > seq_size).
    out_long = jax.block_until_ready(word2vec_embedding(ids_long, emb_table, SEQ_SIZE))
    assert jnp.allclose(out_long, reference(ids_long), atol=1e-6), "VMEM path (crop) mismatch"

    # Large-vocab path (HBM-resident table, manual row DMAs), forced for coverage.
    out_hbm = jax.block_until_ready(
        word2vec_embedding(ids_short, emb_table, SEQ_SIZE, table_in_vmem=False))
    assert jnp.allclose(out_hbm, reference(ids_short), atol=1e-6), "HBM path mismatch"

    print("KERNEL_OK")
</pallas_src>

<mosaic_0001>
module attributes {stable_mosaic.version = 11 : i64} {
  func.func @_w2v_gather_vmem_kernel(%arg0: i32, %arg1: memref<12xi32, #tpu.memory_space<smem>>, %arg2: memref<1000x300xf32, #tpu.memory_space<vmem>>, %arg3: memref<12x300xf32, #tpu.memory_space<vmem>>) attributes {dimension_semantics = [#tpu.dimension_semantics<arbitrary>], iteration_bounds = array<i64: 1>, scalar_prefetch = 1 : i64, scratch_operands = 0 : i64, tpu.core_type = #tpu.core_type<tc>, window_params = [{pipeline_mode = #tpu.pipeline_mode<synchronous>, transform_indices = @transform_0, window_bounds = array<i64: 1000, 300>}, {pipeline_mode = #tpu.pipeline_mode<synchronous>, transform_indices = @transform_1, window_bounds = array<i64: 12, 300>}]} {
    %cst = arith.constant 0.000000e+00 : f32
    %0 = vector.broadcast %cst : f32 to vector<1x300xf32>
    %c0 = arith.constant 0 : index
    %1 = memref.load %arg1[%c0] : memref<12xi32, #tpu.memory_space<smem>>
    %c0_i32 = arith.constant 0 : i32
    %2 = arith.maxsi %1, %c0_i32 : i32
    %3 = arith.index_cast %2 : i32 to index
    %c0_0 = arith.constant 0 : index
    %4 = vector.load %arg2[%3, %c0_0] : memref<1000x300xf32, #tpu.memory_space<vmem>>, vector<1x300xf32>
    %c0_i32_1 = arith.constant 0 : i32
    %5 = arith.cmpi sge, %1, %c0_i32_1 : i32
    %6 = arith.select %5, %4, %0 : vector<1x300xf32>
    %c0_2 = arith.constant 0 : index
    %c0_3 = arith.constant 0 : index
    %7 = vector.load %arg3[%c0_2, %c0_3] : memref<12x300xf32, #tpu.memory_space<vmem>>, vector<1x300xf32>
    tpu.vector_store %arg3[%c0_2, %c0_3], %6 {strides = array<i32>} : memref<12x300xf32, #tpu.memory_space<vmem>>, vector<1x300xf32>,
    %c1 = arith.constant 1 : index
    %8 = memref.load %arg1[%c1] : memref<12xi32, #tpu.memory_space<smem>>
    %c0_i32_4 = arith.constant 0 : i32
    %9 = arith.maxsi %8, %c0_i32_4 : i32
    %10 = arith.index_cast %9 : i32 to index
    %c0_5 = arith.constant 0 : index
    %11 = vector.load %arg2[%10, %c0_5] : memref<1000x300xf32, #tpu.memory_space<vmem>>, vector<1x300xf32>
    %c0_i32_6 = arith.constant 0 : i32
    %12 = arith.cmpi sge, %8, %c0_i32_6 : i32
    %13 = arith.select %12, %11, %0 : vector<1x300xf32>
    %c1_7 = arith.constant 1 : index
    %c0_8 = arith.constant 0 : index
    %14 = vector.load %arg3[%c1_7, %c0_8] : memref<12x300xf32, #tpu.memory_space<vmem>>, vector<1x300xf32>
    tpu.vector_store %arg3[%c1_7, %c0_8], %13 {strides = array<i32>} : memref<12x300xf32, #tpu.memory_space<vmem>>, vector<1x300xf32>,
    %c2 = arith.constant 2 : index
    %15 = memref.load %arg1[%c2] : memref<12xi32, #tpu.memory_space<smem>>
    %c0_i32_9 = arith.constant 0 : i32
    %16 = arith.maxsi %15, %c0_i32_9 : i32
    %17 = arith.index_cast %16 : i32 to index
    %c0_10 = arith.constant 0 : index
    %18 = vector.load %arg2[%17, %c0_10] : memref<1000x300xf32, #tpu.memory_space<vmem>>, vector<1x300xf32>
    %c0_i32_11 = arith.constant 0 : i32
    %19 = arith.cmpi sge, %15, %c0_i32_11 : i32
    %20 = arith.select %19, %18, %0 : vector<1x300xf32>
    %c2_12 = arith.constant 2 : index
    %c0_13 = arith.constant 0 : index
    %21 = vector.load %arg3[%c2_12, %c0_13] : memref<12x300xf32, #tpu.memory_space<vmem>>, vector<1x300xf32>
    tpu.vector_store %arg3[%c2_12, %c0_13], %20 {strides = array<i32>} : memref<12x300xf32, #tpu.memory_space<vmem>>, vector<1x300xf32>,
    %c3 = arith.constant 3 : index
    %22 = memref.load %arg1[%c3] : memref<12xi32, #tpu.memory_space<smem>>
    %c0_i32_14 = arith.constant 0 : i32
    %23 = arith.maxsi %22, %c0_i32_14 : i32
    %24 = arith.index_cast %23 : i32 to index
    %c0_15 = arith.constant 0 : index
    %25 = vector.load %arg2[%24, %c0_15] : memref<1000x300xf32, #tpu.memory_space<vmem>>, vector<1x300xf32>
    %c0_i32_16 = arith.constant 0 : i32
    %26 = arith.cmpi sge, %22, %c0_i32_16 : i32
    %27 = arith.select %26, %25, %0 : vector<1x300xf32>
    %c3_17 = arith.constant 3 : index
    %c0_18 = arith.constant 0 : index
    %28 = vector.load %arg3[%c3_17, %c0_18] : memref<12x300xf32, #tpu.memory_space<vmem>>, vector<1x300xf32>
    tpu.vector_store %arg3[%c3_17, %c0_18], %27 {strides = array<i32>} : memref<12x300xf32, #tpu.memory_space<vmem>>, vector<1x300xf32>,
    %c4 = arith.constant 4 : index
    %29 = memref.load %arg1[%c4] : memref<12xi32, #tpu.memory_space<smem>>
    %c0_i32_19 = arith.constant 0 : i32
    %30 = arith.maxsi %29, %c0_i32_19 : i32
    %31 = arith.index_cast %30 : i32 to index
    %c0_20 = arith.constant 0 : index
    %32 = vector.load %arg2[%31, %c0_20] : memref<1000x300xf32, #tpu.memory_space<vmem>>, vector<1x300xf32>
    %c0_i32_21 = arith.constant 0 : i32
    %33 = arith.cmpi sge, %29, %c0_i32_21 : i32
    %34 = arith.select %33, %32, %0 : vector<1x300xf32>
    %c4_22 = arith.constant 4 : index
    %c0_23 = arith.constant 0 : index
    %35 = vector.load %arg3[%c4_22, %c0_23] : memref<12x300xf32, #tpu.memory_space<vmem>>, vector<1x300xf32>
    tpu.vector_store %arg3[%c4_22, %c0_23], %34 {strides = array<i32>} : memref<12x300xf32, #tpu.memory_space<vmem>>, vector<1x300xf32>,
    %c5 = arith.constant 5 : index
    %36 = memref.load %arg1[%c5] : memref<12xi32, #tpu.memory_space<smem>>
    %c0_i32_24 = arith.constant 0 : i32
    %37 = arith.maxsi %36, %c0_i32_24 : i32
    %38 = arith.index_cast %37 : i32 to index
    %c0_25 = arith.constant 0 : index
    %39 = vector.load %arg2[%38, %c0_25] : memref<1000x300xf32, #tpu.memory_space<vmem>>, vector<1x300xf32>
    %c0_i32_26 = arith.constant 0 : i32
    %40 = arith.cmpi sge, %36, %c0_i32_26 : i32
    %41 = arith.select %40, %39, %0 : vector<1x300xf32>
    %c5_27 = arith.constant 5 : index
    %c0_28 = arith.constant 0 : index
    %42 = vector.load %arg3[%c5_27, %c0_28] : memref<12x300xf32, #tpu.memory_space<vmem>>, vector<1x300xf32>
    tpu.vector_store %arg3[%c5_27, %c0_28], %41 {strides = array<i32>} : memref<12x300xf32, #tpu.memory_space<vmem>>, vector<1x300xf32>,
    %c6 = arith.constant 6 : index
    %43 = memref.load %arg1[%c6] : memref<12xi32, #tpu.memory_space<smem>>
    %c0_i32_29 = arith.constant 0 : i32
    %44 = arith.maxsi %43, %c0_i32_29 : i32
    %45 = arith.index_cast %44 : i32 to index
    %c0_30 = arith.constant 0 : index
    %46 = vector.load %arg2[%45, %c0_30] : memref<1000x300xf32, #tpu.memory_space<vmem>>, vector<1x300xf32>
    %c0_i32_31 = arith.constant 0 : i32
    %47 = arith.cmpi sge, %43, %c0_i32_31 : i32
    %48 = arith.select %47, %46, %0 : vector<1x300xf32>
    %c6_32 = arith.constant 6 : index
    %c0_33 = arith.constant 0 : index
    %49 = vector.load %arg3[%c6_32, %c0_33] : memref<12x300xf32, #tpu.memory_space<vmem>>, vector<1x300xf32>
    tpu.vector_store %arg3[%c6_32, %c0_33], %48 {strides = array<i32>} : memref<12x300xf32, #tpu.memory_space<vmem>>, vector<1x300xf32>,
    %c7 = arith.constant 7 : index
    %50 = memref.load %arg1[%c7] : memref<12xi32, #tpu.memory_space<smem>>
    %c0_i32_34 = arith.constant 0 : i32
    %51 = arith.maxsi %50, %c0_i32_34 : i32
    %52 = arith.index_cast %51 : i32 to index
    %c0_35 = arith.constant 0 : index
    %53 = vector.load %arg2[%52, %c0_35] : memref<1000x300xf32, #tpu.memory_space<vmem>>, vector<1x300xf32>
    %c0_i32_36 = arith.constant 0 : i32
    %54 = arith.cmpi sge, %50, %c0_i32_36 : i32
    %55 = arith.select %54, %53, %0 : vector<1x300xf32>
    %c7_37 = arith.constant 7 : index
    %c0_38 = arith.constant 0 : index
    %56 = vector.load %arg3[%c7_37, %c0_38] : memref<12x300xf32, #tpu.memory_space<vmem>>, vector<1x300xf32>
    tpu.vector_store %arg3[%c7_37, %c0_38], %55 {strides = array<i32>} : memref<12x300xf32, #tpu.memory_space<vmem>>, vector<1x300xf32>,
    %c8 = arith.constant 8 : index
    %57 = memref.load %arg1[%c8] : memref<12xi32, #tpu.memory_space<smem>>
    %c0_i32_39 = arith.constant 0 : i32
    %58 = arith.maxsi %57, %c0_i32_39 : i32
    %59 = arith.index_cast %58 : i32 to index
    %c0_40 = arith.constant 0 : index
    %60 = vector.load %arg2[%59, %c0_40] : memref<1000x300xf32, #tpu.memory_space<vmem>>, vector<1x300xf32>
    %c0_i32_41 = arith.constant 0 : i32
    %61 = arith.cmpi sge, %57, %c0_i32_41 : i32
    %62 = arith.select %61, %60, %0 : vector<1x300xf32>
    %c8_42 = arith.constant 8 : index
    %c0_43 = arith.constant 0 : index
    %63 = vector.load %arg3[%c8_42, %c0_43] : memref<12x300xf32, #tpu.memory_space<vmem>>, vector<1x300xf32>
    tpu.vector_store %arg3[%c8_42, %c0_43], %62 {strides = array<i32>} : memref<12x300xf32, #tpu.memory_space<vmem>>, vector<1x300xf32>,
    %c9 = arith.constant 9 : index
    %64 = memref.load %arg1[%c9] : memref<12xi32, #tpu.memory_space<smem>>
    %c0_i32_44 = arith.constant 0 : i32
    %65 = arith.maxsi %64, %c0_i32_44 : i32
    %66 = arith.index_cast %65 : i32 to index
    %c0_45 = arith.constant 0 : index
    %67 = vector.load %arg2[%66, %c0_45] : memref<1000x300xf32, #tpu.memory_space<vmem>>, vector<1x300xf32>
    %c0_i32_46 = arith.constant 0 : i32
    %68 = arith.cmpi sge, %64, %c0_i32_46 : i32
    %69 = arith.select %68, %67, %0 : vector<1x300xf32>
    %c9_47 = arith.constant 9 : index
    %c0_48 = arith.constant 0 : index
    %70 = vector.load %arg3[%c9_47, %c0_48] : memref<12x300xf32, #tpu.memory_space<vmem>>, vector<1x300xf32>
    tpu.vector_store %arg3[%c9_47, %c0_48], %69 {strides = array<i32>} : memref<12x300xf32, #tpu.memory_space<vmem>>, vector<1x300xf32>,
    %c10 = arith.constant 10 : index
    %71 = memref.load %arg1[%c10] : memref<12xi32, #tpu.memory_space<smem>>
    %c0_i32_49 = arith.constant 0 : i32
    %72 = arith.maxsi %71, %c0_i32_49 : i32
    %73 = arith.index_cast %72 : i32 to index
    %c0_50 = arith.constant 0 : index
    %74 = vector.load %arg2[%73, %c0_50] : memref<1000x300xf32, #tpu.memory_space<vmem>>, vector<1x300xf32>
    %c0_i32_51 = arith.constant 0 : i32
    %75 = arith.cmpi sge, %71, %c0_i32_51 : i32
    %76 = arith.select %75, %74, %0 : vector<1x300xf32>
    %c10_52 = arith.constant 10 : index
    %c0_53 = arith.constant 0 : index
    %77 = vector.load %arg3[%c10_52, %c0_53] : memref<12x300xf32, #tpu.memory_space<vmem>>, vector<1x300xf32>
    tpu.vector_store %arg3[%c10_52, %c0_53], %76 {strides = array<i32>} : memref<12x300xf32, #tpu.memory_space<vmem>>, vector<1x300xf32>,
    %c11 = arith.constant 11 : index
    %78 = memref.load %arg1[%c11] : memref<12xi32, #tpu.memory_space<smem>>
    %c0_i32_54 = arith.constant 0 : i32
    %79 = arith.maxsi %78, %c0_i32_54 : i32
    %80 = arith.index_cast %79 : i32 to index
    %c0_55 = arith.constant 0 : index
    %81 = vector.load %arg2[%80, %c0_55] : memref<1000x300xf32, #tpu.memory_space<vmem>>, vector<1x300xf32>
    %c0_i32_56 = arith.constant 0 : i32
    %82 = arith.cmpi sge, %78, %c0_i32_56 : i32
    %83 = arith.select %82, %81, %0 : vector<1x300xf32>
    %c11_57 = arith.constant 11 : index
    %c0_58 = arith.constant 0 : index
    %84 = vector.load %arg3[%c11_57, %c0_58] : memref<12x300xf32, #tpu.memory_space<vmem>>, vector<1x300xf32>
    tpu.vector_store %arg3[%c11_57, %c0_58], %83 {strides = array<i32>} : memref<12x300xf32, #tpu.memory_space<vmem>>, vector<1x300xf32>,
    return
  }
  func.func @transform_0(%arg0: i32, %arg1: memref<12xi32, #tpu.memory_space<smem>>) -> (i32, i32) {
    %c0_i32 = arith.constant 0 : i32
    %c0_i32_0 = arith.constant 0 : i32
    %c0_i32_1 = arith.constant 0 : i32
    return %c0_i32, %c0_i32_0 : i32, i32
  }
  func.func @transform_1(%arg0: i32, %arg1: memref<12xi32, #tpu.memory_space<smem>>) -> (i32, i32) {
    %c0_i32 = arith.constant 0 : i32
    %c0_i32_0 = arith.constant 0 : i32
    %c0_i32_1 = arith.constant 0 : i32
    return %c0_i32, %c0_i32_0 : i32, i32
  }
}

</mosaic_0001>

<bundles_post_ra>
// kernel: tpu_custom_call.1
= control target key start
LH: loop header
LB: loop body
LE: loop exit
PB: predicated region body
PF: predicated region fallthrough
CT: control target
= control target key end

     0   :  { %s571_s0 = inlined_call_operand.vmem [shape: s32[12], index: 0, kind: input, shape index: {}]   ;;  %s572_s1 = inlined_call_operand.vmem [shape: f32[1000,300], index: 1, kind: input, shape index: {}]   ;;  %s573_s2 = inlined_call_operand.hbm [shape: f32[12,300], index: 2, kind: output, shape index: {}]  }
   0x1   :  { %s7_s11 = sshll.u32 %s571_s0, 4  ;;  %s8_s11 = int_to_ptr.vmem [resolvable:$true] %s7_s11 }
   0x2   :  { %s338_s12 = scalar_lea.vmem %s8_s11, 16  ;;  %p343_p1 = scmp.lt.s32.totalorder %s8_s11, %s8_s11 }
   0x3   :  { %p339_p0 = scmp.ne.s32.totalorder %s8_s11, %s338_s12  ;;  %p344_p2 = scmp.lt.s32.totalorder %s338_s12, %s338_s12 }
   0x5   :  { %p345_p3 = por %p344_p2, %p343_p1 }
   0x7   :  { %p346_p4 = pnand %p345_p3, %p339_p0 }
   0x9   :  { %349 = shalt.err (!%p346_p4)  }
   0xa   :  { %s376_s13 = smov [#allocation3]  }
   0xb   :  { %10 = dma.vmem_to_smem %s8_s11, 16, %s376_s13, [#allocation2] }
   0xc   :  { %372 = dma.done.wait [#allocation2], 16 }
   0xd   :  { %373 = vsyncadd [#allocation2], 4294967280 }
   0xe   :  { %12 = sfence }
   0xf   :  { %s16_s14 = sld [smem:[#allocation3]]  ;;  %s398_s15 = sld [smem:[#allocation3 + $0x1]] }
  0x10   :  { %13 = vsyncpa [#allocation5], 0  ;;  %s400_s0 = sld [smem:[#allocation3 + $0x2]]  ;;  %s402_s16 = sld [smem:[#allocation3 + $0x3]]  ;;  %v33_v0 = vlaneseq }
  0x11   :  { %s404_s17 = sld [smem:[#allocation3 + $0x4]]  ;;  %s406_s18 = sld [smem:[#allocation3 + $0x5]] }
  0x12   :  { %s408_s19 = sld [smem:[#allocation3 + $0x6]]  ;;  %s410_s20 = sld [smem:[#allocation3 + $0x7]]  ;;  %vm428_vm1 = vcmp.lt.s32.totalorder %v33_v0, 300 }
  0x13   :  { %s412_s21 = sld [smem:[#allocation3 + $0x8]]  ;;  %s414_s22 = sld [smem:[#allocation3 + $0x9]] }
  0x14   :  { %s416_s23 = sld [smem:[#allocation3 + $0xa]]  ;;  %s418_s24 = sld [smem:[#allocation3 + $0xb]] }
  0x15   :  { %p17_p5 = scmp.gt.s32.totalorder %s16_s14, 0  ;;  %p28_p6 = scmp.ge.s32.totalorder %s16_s14, 0 }
  0x16   :  { %p40_p7 = scmp.gt.s32.totalorder %s398_s15, 0  ;;  %p51_p8 = scmp.ge.s32.totalorder %s398_s15, 0 }
  0x17   :  { %s577_s14 = smov (!%p17_p5, %s16_s14), 0  ;;  %p60_p9 = scmp.gt.s32.totalorder %s400_s0, 0 }
  0x18   :  { %s29_s25 = scalar_select %p28_p6, 1, 0 }
  0x19   :  { %s19_s26 = sshra.s32 %s577_s14, 3  ;;  %s22_s27 = sand.u32 7, %s577_s14 }
  0x1a   :  { %s311_s28 = smul.u32 24, %s19_s26  ;;  %v30_v1 = vstv %s29_s25  ;;  %p71_p10 = scmp.ge.s32.totalorder %s400_s0, 0 }
  0x1b   :  { %s41_s29 = scalar_select %p40_p7, %s398_s15, 0  ;;  %vm31_vm0 = vcmp.eq.s32.totalorder %v30_v1, 1 }
  0x1c   :  { %s25_s30 = sadd.s32 %s311_s28, %s22_s27  ;;  %p80_p11 = scmp.gt.s32.totalorder %s402_s16, 0 }
  0x1d   :  { %s26_s5 = scalar_lea.vmem %s572_s1, %s25_s30  ;;  %s42_s6 = sshra.s32 %s41_s29, 3 }
  0x1e   :  { %v27_v3 = vld [vmem:[%s26_s5] ss:$8 sm:$0x7]  ;;  %s45_s7 = sand.u32 7, %s41_s29  ;;  %s313_s8 = smul.u32 24, %s42_s6 }
  0x1f   :  { %v32_v4 = vsel %vm31_vm0, %v27_v3, 0.0  ;;  %s52_s9 = scalar_select %p51_p8, 1, 0 }
  0x20   :  { %37 = vst.msk [vmem:[#allocation4] ss:$8 sm:$0x7] %vm428_vm1, %v32_v4  ;;  %s48_s10 = sadd.s32 %s313_s8, %s45_s7  ;;  %p91_p12 = scmp.ge.s32.totalorder %s402_s16, 0 }
  0x21   :  { %s49_s13 = scalar_lea.vmem %s572_s1, %s48_s10  ;;  %v53_v5 = vstv %s52_s9  ;;  %p100_p13 = scmp.gt.s32.totalorder %s404_s17, 0 }
  0x22   :  { %v50_v6 = vld [vmem:[%s49_s13] ss:$8 sm:$0x7]  ;;  %vm54_vm2 = vcmp.eq.s32.totalorder %v53_v5, 1  ;;  %s61_s14 = scalar_select %p60_p9, %s400_s0, 0 }
  0x23   :  { %v55_v7 = vsel %vm54_vm2, %v50_v6, 0.0  ;;  %s72_s15 = scalar_select %p71_p10, 1, 0 }
  0x24   :  { %57 = vst.msk [vmem:[#allocation4 + $0x1] ss:$8 sm:$0x7] %vm428_vm1, %v55_v7  ;;  %s62_s25 = sshra.s32 %s61_s14, 3  ;;  %s65_s26 = sand.u32 7, %s61_s14 }
  0x25   :  { %s315_s27 = smul.u32 24, %s62_s25  ;;  %v73_v8 = vstv %s72_s15  ;;  %p111_p0 = scmp.ge.s32.totalorder %s404_s17, 0 }
  0x26   :  { %s81_s28 = scalar_select %p80_p11, %s402_s16, 0  ;;  %vm74_vm3 = vcmp.eq.s32.totalorder %v73_v8, 1 }
  0x27   :  { %s68_s29 = sadd.s32 %s315_s27, %s65_s26  ;;  %p120_p1 = scmp.gt.s32.totalorder %s406_s18, 0 }
  0x28   :  { %s69_s0 = scalar_lea.vmem %s572_s1, %s68_s29  ;;  %s82_s4 = sshra.s32 %s81_s28, 3 }
  0x29   :  { %v70_v9 = vld [vmem:[%s69_s0] ss:$8 sm:$0x7]  ;;  %s85_s5 = sand.u32 7, %s81_s28  ;;  %s317_s6 = smul.u32 24, %s82_s4 }
  0x2a   :  { %v75_v10 = vsel %vm74_vm3, %v70_v9, 0.0  ;;  %s92_s7 = scalar_select %p91_p12, 1, 0 }
  0x2b   :  { %77 = vst.msk [vmem:[#allocation4 + $0x2] ss:$8 sm:$0x7] %vm428_vm1, %v75_v10  ;;  %s88_s8 = sadd.s32 %s317_s6, %s85_s5  ;;  %p131_p2 = scmp.ge.s32.totalorder %s406_s18, 0 }
  0x2c   :  { %s89_s11 = scalar_lea.vmem %s572_s1, %s88_s8  ;;  %v93_v11 = vstv %s92_s7  ;;  %p140_p3 = scmp.gt.s32.totalorder %s408_s19, 0 }
  0x2d   :  { %v90_v12 = vld [vmem:[%s89_s11] ss:$8 sm:$0x7]  ;;  %vm94_vm4 = vcmp.eq.s32.totalorder %v93_v11, 1  ;;  %s101_s16 = scalar_select %p100_p13, %s404_s17, 0 }
  0x2e   :  { %v95_v13 = vsel %vm94_vm4, %v90_v12, 0.0  ;;  %s112_s12 = scalar_select %p111_p0, 1, 0 }
  0x2f   :  { %97 = vst.msk [vmem:[#allocation4 + $0x3] ss:$8 sm:$0x7] %vm428_vm1, %v95_v13  ;;  %s102_s13 = sshra.s32 %s101_s16, 3  ;;  %s105_s14 = sand.u32 7, %s101_s16 }
  0x30   :  { %s319_s15 = smul.u32 24, %s102_s13  ;;  %v113_v14 = vstv %s112_s12  ;;  %p151_p4 = scmp.ge.s32.totalorder %s408_s19, 0 }
  0x31   :  { %s121_s25 = scalar_select %p120_p1, %s406_s18, 0  ;;  %vm114_vm5 = vcmp.eq.s32.totalorder %v113_v14, 1 }
  0x32   :  { %s108_s26 = sadd.s32 %s319_s15, %s105_s14  ;;  %p160_p5 = scmp.gt.s32.totalorder %s410_s20, 0 }
  0x33   :  { %s109_s17 = scalar_lea.vmem %s572_s1, %s108_s26  ;;  %s122_s29 = sshra.s32 %s121_s25, 3 }
  0x34   :  { %v110_v15 = vld [vmem:[%s109_s17] ss:$8 sm:$0x7]  ;;  %s125_s30 = sand.u32 7, %s121_s25  ;;  %s321_s3 = smul.u32 24, %s122_s29 }
  0x35   :  { %v115_v16 = vsel %vm114_vm5, %v110_v15, 0.0  ;;  %s132_s0 = scalar_select %p131_p2, 1, 0 }
  0x36   :  { %117 = vst.msk [vmem:[#allocation4 + $0x4] ss:$8 sm:$0x7] %vm428_vm1, %v115_v16  ;;  %s128_s4 = sadd.s32 %s321_s3, %s125_s30  ;;  %p171_p6 = scmp.ge.s32.totalorder %s410_s20, 0 }
  0x37   :  { %s129_s7 = scalar_lea.vmem %s572_s1, %s128_s4  ;;  %v133_v17 = vstv %s132_s0  ;;  %p180_p7 = scmp.gt.s32.totalorder %s412_s21, 0 }
  0x38   :  { %v130_v18 = vld [vmem:[%s129_s7] ss:$8 sm:$0x7]  ;;  %vm134_vm6 = vcmp.eq.s32.totalorder %v133_v17, 1  ;;  %s141_s18 = scalar_select %p140_p3, %s408_s19, 0 }
  0x39   :  { %v135_v19 = vsel %vm134_vm6, %v130_v18, 0.0  ;;  %s152_s8 = scalar_select %p151_p4, 1, 0 }
  0x3a   :  { %137 = vst.msk [vmem:[#allocation4 + $0x5] ss:$8 sm:$0x7] %vm428_vm1, %v135_v19  ;;  %s142_s9 = sshra.s32 %s141_s18, 3  ;;  %s145_s10 = sand.u32 7, %s141_s18 }
  0x3b   :  { %s323_s11 = smul.u32 24, %s142_s9  ;;  %v153_v20 = vstv %s152_s8  ;;  %p191_p8 = scmp.ge.s32.totalorder %s412_s21, 0 }
  0x3c   :  { %s161_s16 = scalar_select %p160_p5, %s410_s20, 0  ;;  %vm154_vm7 = vcmp.eq.s32.totalorder %v153_v20, 1 }
  0x3d   :  { %s148_s12 = sadd.s32 %s323_s11, %s145_s10  ;;  %p200_p9 = scmp.gt.s32.totalorder %s414_s22, 0 }
  0x3e   :  { %s149_s19 = scalar_lea.vmem %s572_s1, %s148_s12  ;;  %s162_s15 = sshra.s32 %s161_s16, 3 }
  0x3f   :  { %v150_v21 = vld [vmem:[%s149_s19] ss:$8 sm:$0x7]  ;;  %s165_s25 = sand.u32 7, %s161_s16  ;;  %s325_s26 = smul.u32 24, %s162_s15 }
  0x40   :  { %v155_v22 = vsel %vm154_vm7, %v150_v21, 0.0  ;;  %s172_s27 = scalar_select %p171_p6, 1, 0 }
  0x41   :  { %157 = vst.msk [vmem:[#allocation4 + $0x6] ss:$8 sm:$0x7] %vm428_vm1, %v155_v22  ;;  %s168_s28 = sadd.s32 %s325_s26, %s165_s25  ;;  %p211_p10 = scmp.ge.s32.totalorder %s414_s22, 0 }
  0x42   :  { %s169_s30 = scalar_lea.vmem %s572_s1, %s168_s28  ;;  %v173_v23 = vstv %s172_s27  ;;  %p220_p11 = scmp.gt.s32.totalorder %s416_s23, 0 }
  0x43   :  { %v170_v24 = vld [vmem:[%s169_s30] ss:$8 sm:$0x7]  ;;  %vm174_vm8 = vcmp.eq.s32.totalorder %v173_v23, 1  ;;  %s181_s20 = scalar_select %p180_p7, %s412_s21, 0 }
  0x44   :  { %v175_v25 = vsel %vm174_vm8, %v170_v24, 0.0  ;;  %s192_s3 = scalar_select %p191_p8, 1, 0 }
  0x45   :  { %177 = vst.msk [vmem:[#allocation4 + $0x7] ss:$8 sm:$0x7] %vm428_vm1, %v175_v25  ;;  %s182_s0 = sshra.s32 %s181_s20, 3  ;;  %s185_s4 = sand.u32 7, %s181_s20 }
  0x46   :  { %s327_s5 = smul.u32 24, %s182_s0  ;;  %v193_v26 = vstv %s192_s3  ;;  %p231_p12 = scmp.ge.s32.totalorder %s416_s23, 0 }
  0x47   :  { %s201_s6 = scalar_select %p200_p9, %s414_s22, 0  ;;  %vm194_vm9 = vcmp.eq.s32.totalorder %v193_v26, 1 }
  0x48   :  { %s188_s7 = sadd.s32 %s327_s5, %s185_s4  ;;  %p240_p13 = scmp.gt.s32.totalorder %s418_s24, 0 }
  0x49   :  { %s189_s21 = scalar_lea.vmem %s572_s1, %s188_s7  ;;  %s202_s9 = sshra.s32 %s201_s6, 3 }
  0x4a   :  { %v190_v27 = vld [vmem:[%s189_s21] ss:$8 sm:$0x7]  ;;  %s205_s10 = sand.u32 7, %s201_s6  ;;  %s329_s11 = smul.u32 24, %s202_s9 }
  0x4b   :  { %v195_v28 = vsel %vm194_vm9, %v190_v27, 0.0  ;;  %s212_s16 = scalar_select %p211_p10, 1, 0 }
  0x4c   :  { %197 = vst.msk [vmem:[#allocation4 + $0x18] ss:$8 sm:$0x7] %vm428_vm1, %v195_v28  ;;  %s208_s12 = sadd.s32 %s329_s11, %s205_s10  ;;  %p251_p0 = scmp.ge.s32.totalorder %s418_s24, 0 }
  0x4d   :  { %s209_s19 = scalar_lea.vmem %s572_s1, %s208_s12  ;;  %v213_v29 = vstv %s212_s16  ;;  %s377_s29 = smov [#allocation4]  }
  0x4e   :  { %v210_v30 = vld [vmem:[%s209_s19] ss:$8 sm:$0x7]  ;;  %vm214_vm10 = vcmp.eq.s32.totalorder %v213_v29, 1  ;;  %s221_s15 = scalar_select %p220_p11, %s416_s23, 0 }
  0x4f   :  { %v215_v31 = vsel %vm214_vm10, %v210_v30, 0.0  ;;  %s232_s22 = scalar_select %p231_p12, 1, 0 }
  0x50   :  { %217 = vst.msk [vmem:[#allocation4 + $0x19] ss:$8 sm:$0x7] %vm428_vm1, %v215_v31  ;;  %s222_s25 = sshra.s32 %s221_s15, 3  ;;  %s225_s26 = sand.u32 7, %s221_s15 }
  0x51   :  { %s331_s27 = smul.u32 24, %s222_s25  ;;  %v233_v32 = vstv %s232_s22  ;;  %s264_s30 = sshll.u32 %s377_s29, 4  ;;  %s265_s30 = int_to_ptr.vmem [resolvable:$true] %s264_s30 }
  0x52   :  { %s241_s28 = scalar_select %p240_p13, %s418_s24, 0  ;;  %vm234_vm11 = vcmp.eq.s32.totalorder %v233_v32, 1 }
  0x53   :  { %s228_s17 = sadd.s32 %s331_s27, %s225_s26  ;;  %s350_s9 = scalar_lea.vmem %s265_s30, 768 }
  0x54   :  { %s229_s0 = scalar_lea.vmem %s572_s1, %s228_s17  ;;  %s242_s23 = sshra.s32 %s241_s28, 3 }
  0x55   :  { %v230_v33 = vld [vmem:[%s229_s0] ss:$8 sm:$0x7]  ;;  %s245_s4 = sand.u32 7, %s241_s28  ;;  %s333_s5 = smul.u32 24, %s242_s23 }
  0x56   :  { %v235_v34 = vsel %vm234_vm11, %v230_v33, 0.0  ;;  %s252_s6 = scalar_select %p251_p0, 1, 0 }
  0x57   :  { %237 = vst.msk [vmem:[#allocation4 + $0x1a] ss:$8 sm:$0x7] %vm428_vm1, %v235_v34  ;;  %s248_s7 = sadd.s32 %s333_s5, %s245_s4  ;;  %p351_p1 = scmp.ne.s32.totalorder %s265_s30, %s350_s9 }
  0x58   :  { %s249_s21 = scalar_lea.vmem %s572_s1, %s248_s7  ;;  %v253_v35 = vstv %s252_s6  ;;  %p355_p2 = scmp.lt.s32.totalorder %s265_s30, %s265_s30 }
  0x59   :  { %v250_v36 = vld [vmem:[%s249_s21] ss:$8 sm:$0x7]  ;;  %vm254_vm12 = vcmp.eq.s32.totalorder %v253_v35, 1  ;;  %p356_p3 = scmp.lt.s32.totalorder %s350_s9, %s350_s9 }
  0x5a   :  { %v255_v37 = vsel %vm254_vm12, %v250_v36, 0.0 }
  0x5b   :  { %257 = vst.msk [vmem:[#allocation4 + $0x1b] ss:$8 sm:$0x7] %vm428_vm1, %v255_v37  ;;  %p357_p4 = por %p356_p3, %p355_p2 }
  0x5d   :  { %p358_p5 = pnand %p357_p4, %p351_p1 }
  0x5f   :  { %361 = shalt.err (!%p358_p5)
}
  0x60   :  { %s362_s11 = scalar_lea.hbm %s573_s2, 768 }
  0x61   :  { %p363_p6 = scmp.ne.s32.totalorder %s573_s2, %s362_s11  ;;  %p366_p7 = scmp.lt.u32.totalorder %s362_s11, %s573_s2 }
  0x63   :  { %p368_p8 = pnand %p366_p7, %p363_p6 }
  0x65   :  { %371 = shalt.err (!%p368_p8)
}
  0x66   :  { %s378_s14 = smov 384   ;;  %s379_s19 = smov 24  }
  0x67   :  { %270 = dma.vmem_to_hbm [thread:$0]  %s265_s30, 768, %s573_s2, [#allocation5], %s378_s14, %s378_s14, %s379_s19  }
  0x68   :  { %374 = dma.done.wait [#allocation5], 768  }
  0x69   :  { %375 = vsyncadd [#allocation5], 4294966528 }
  0x6a   :  { %274 = vsyncpa [#allocation5], 1 }

</bundles_post_ra>
